<compile_context>
chip_gen: v7x
topology: tpu7x:2x2x1
jax: 0.10.0
libtpu: 0.0.40
codegen_flags: <defaults>
</compile_context>

<pallas_src>
import functools
import math

import jax
import jax.numpy as jnp
from jax import lax
from jax.experimental import pallas as pl
from jax.experimental.pallas import tpu as pltpu


# ----------------------------------------------------------------------------
# Kernel
# ----------------------------------------------------------------------------
def _cluster_assigner_kernel(xt_ref, w_ref, b_ref, cn_ref, rn_ref, sel_ref,
                             adapt_ref, num_ref, psum_ref, *, epsilon, temp):
    f32, bf16 = jnp.float32, jnp.bfloat16
    step = pl.program_id(1)

    @pl.when(step == 0)
    def _init():
        adapt_ref[...] = jnp.zeros_like(adapt_ref)
        num_ref[...] = jnp.zeros_like(num_ref)
        psum_ref[...] = jnp.zeros_like(psum_ref)

    # linear(seq_len -> d_model), transposed: x_emb[d, r] (bf16 MXU, f32 acc).
    # The seq_len axis of the streamed tile is contracted directly -- no
    # in-kernel transpose/reshape.
    x_emb = lax.dot_general(w_ref[...], xt_ref[...],
                            (((1,), (0,)), ((), ())),
                            preferred_element_type=f32) + b_ref[...]   # [d, tr]

    # F.normalize(dim=1): per-row l2 norm == reduce over d_model (axis 0 here),
    # rsqrt on the EUP.
    xn = x_emb * lax.rsqrt(jnp.maximum(
        jnp.sum(x_emb * x_emb, axis=0, keepdims=True), 1e-24))

    # prob[c, r] = l2norm(x_emb) . l2norm(cluster_emb)  (cn pre-normalized in
    # the wrapper).  Lane axis stays rows -> lane-dense.
    prob = lax.dot_general(cn_ref[...], xn.astype(bf16),
                           (((1,), (0,)), ((), ())),
                           preferred_element_type=f32)                 # [nc, tr]

    # per-row sinkhorn over clusters (axis 0), kept in f32 (exp(prob/0.05)~e^20)
    q = jnp.exp(prob * (1.0 / epsilon))
    sq = jnp.sum(q, axis=0, keepdims=True)
    r = pl.reciprocal(sq, approx=True)
    r = r * (2.0 - sq * r)           # one Newton step -> ~f32-accurate, no divide
    pt = q * r

    # concrete bernoulli.  rn = log(u) - log(1-u) streamed in bf16; padded rows
    # carry rn = -1e9 so their mask is exactly 0 (no contribution below).
    logit = jnp.log(pt + 1e-10) - jnp.log(1.0 - pt + 1e-10)
    mask = jax.nn.sigmoid((logit + rn_ref[...].astype(f32)) * (1.0 / temp))

    # ---- partial reductions over this tile's rows, accumulated in the outputs
    adapt_ref[0] += lax.dot_general(mask.astype(bf16), x_emb.astype(bf16),
                                    (((1,), (1,)), ((), ())),
                                    preferred_element_type=f32)   # [nc, d_model]
    num_ref[0] += jnp.sum(mask, axis=1, keepdims=True)            # [nc, 1]
    # sum over batch of prob, grouped by variable, via a one-hot selector
    # (f32 operands -> exact; selector is zero on padded rows).
    psum_ref[0] += lax.dot_general(prob, sel_ref[...],
                                   (((1,), (1,)), ((), ())),
                                   preferred_element_type=f32)    # [nc, n_vars]


# ----------------------------------------------------------------------------
# Tiling / VMEM sizing
# ----------------------------------------------------------------------------
def _round_up(a, m):
    return -(-a // m) * m


def _vmem_limit_bytes():
    """Generation-aware scoped-VMEM limit (~100 MiB on 128 MiB v5e/v6e,
    ~50 MiB on the 64 MiB-per-TC v7x).  Tiles are sized against 75% of this."""
    cap = 128 * 1024 * 1024
    try:
        info = pltpu.get_tpu_info()
        cap = int(getattr(info, "vmem_capacity_bytes", cap))
    except Exception:
        pass
    return int(cap * 0.78)


def _padded_step_bytes(tr, seq_len, n_vars, n_cluster, d_model):
    """Real (layout-padded) VMEM bytes for one pipeline step: double-buffered
    input windows, resident output accumulators and live intermediates.
    bf16 tiles pad to (16,128), f32 tiles to (8,128)."""
    bf16, f32, lane = 2, 4, 128
    n = 0
    # streamed, double-buffered inputs (lane axis = rows -> no lane padding)
    n += 2 * _round_up(seq_len, 16) * tr * bf16              # x_t   [S,  tr]
    n += 2 * _round_up(n_cluster, 16) * tr * bf16            # rn    [nc, tr]
    n += 2 * _round_up(n_vars, 8) * tr * f32                 # sel   [nv, tr]
    # loop-invariant operands (still pipeline-buffered)
    n += 2 * _round_up(d_model, 16) * _round_up(seq_len, lane) * bf16   # w
    n += 2 * _round_up(d_model, 8) * lane * f32                         # bias
    n += 2 * _round_up(n_cluster, 16) * _round_up(d_model, lane) * bf16 # cn
    # resident output accumulators
    n += 2 * _round_up(n_cluster, 8) * _round_up(d_model, lane) * f32   # adapt
    n += 2 * _round_up(n_cluster, 8) * lane * f32                       # num
    n += 2 * _round_up(n_cluster, 8) * _round_up(n_vars, lane) * f32    # psum
    # live intermediates: x_emb/xn f32 + bf16 casts, ~5 [nc, tr] f32 temps
    n += (2 * _round_up(d_model, 8) * f32 + 2 * _round_up(d_model, 16) * bf16) * tr
    n += 5 * _round_up(n_cluster, 8) * tr * f32
    return n


def _choose_rows_tile(bn, seq_len, n_vars, n_cluster, d_model, budget_bytes,
                      rows_cap=None):
    """Pick the lane-axis row tile `tr` and the (parallel, arbitrary) grid
    split.  Returns (tr, n_par, n_steps, bn_pad)."""
    est = lambda t: _padded_step_bytes(t, seq_len, n_vars, n_cluster, d_model)
    if bn <= 128 and (rows_cap is None or rows_cap >= bn):
        return bn, 1, 1, bn          # single tile; block == full array is legal
    # Row tiles must be lane-aligned (multiples of 128).  Keep at least two
    # tiles so the leading "parallel" axis can feed both v7x TensorCores.
    tr_cap = max(128, _round_up(-(-bn // 2), 128))
    if rows_cap is not None:
        tr_cap = max(128, min(tr_cap, _round_up(rows_cap, 128)))
    tr = 128                          # minimum lane-aligned tile
    while tr * 2 <= tr_cap and est(tr * 2) <= budget_bytes:
        tr *= 2
    if tr < tr_cap and est(tr_cap) <= budget_bytes:
        tr = tr_cap
    n_tiles = -(-bn // tr)
    if n_tiles > 1 and n_tiles % 2:
        n_tiles += 1                  # extra fully-masked tile keeps n_par == 2
    n_par = 2 if n_tiles >= 2 else 1
    n_steps = n_tiles // n_par
    return tr, n_par, n_steps, n_tiles * tr


# ----------------------------------------------------------------------------
# Wrapper
# ----------------------------------------------------------------------------
def cluster_assigner_forward(x, cluster_emb, w, b, noise,
                             epsilon=0.05, temp=0.07, rows_per_step=None):
    """x: [bs, seq_len, n_vars]; cluster_emb: [n_cluster, d_model];
    w: [d_model, seq_len] (nn.Linear weight); b: [d_model];
    noise: [bs*n_vars, n_cluster] uniform(1e-10, 1-1e-10).
    Returns (prob_avg [n_vars, n_cluster], cluster_emb_out [n_cluster, d_model])."""
    bs, seq_len, n_vars = x.shape
    n_cluster, d_model = cluster_emb.shape
    bn = bs * n_vars
    assert noise.shape == (bn, n_cluster)

    f32, bf16 = jnp.float32, jnp.bfloat16
    ce = cluster_emb.astype(f32)

    vmem_limit = _vmem_limit_bytes()
    tr, n_par, n_steps, bn_pad = _choose_rows_tile(
        bn, seq_len, n_vars, n_cluster, d_model,
        budget_bytes=int(vmem_limit * 0.75), rows_cap=rows_per_step)
    pad = bn_pad - bn

    # Lane-dense bf16 inputs (each a single fused cast/transpose/pad XLA pass).
    x_t = jnp.pad(jnp.transpose(x.astype(f32), (1, 0, 2)).reshape(seq_len, bn),
                  ((0, 0), (0, pad))).astype(bf16)                   # [S, bn_pad]
    rn = jnp.log(noise.astype(f32)) - jnp.log(1.0 - noise.astype(f32))
    rn_t = jnp.pad(rn.T, ((0, 0), (0, pad)),
                   constant_values=-1e9).astype(bf16)                # [nc, bn_pad]
    # Hoisted constants: bf16 weight, l2-normalized cluster embedding.
    w_b = w.astype(f32).astype(bf16)
    b_col = b.reshape(d_model, 1).astype(f32)
    cn = (ce / jnp.maximum(jnp.linalg.norm(ce, axis=1, keepdims=True), 1e-12)
          ).astype(bf16)
    # One-hot selector: sel[v, r] = (r % n_vars == v) and r < bn (pad rows = 0).
    r_idx = jnp.arange(bn_pad)
    sel = (((r_idx[None, :] % n_vars) == jnp.arange(n_vars)[:, None])
           & (r_idx[None, :] < bn)).astype(f32)                      # [nv, bn_pad]

    kernel = functools.partial(_cluster_assigner_kernel,
                               epsilon=epsilon, temp=temp)

    out_shape = (
        jax.ShapeDtypeStruct((n_par, n_cluster, d_model), f32),  # partial adapt
        jax.ShapeDtypeStruct((n_par, n_cluster, 1), f32),        # partial num
        jax.ShapeDtypeStruct((n_par, n_cluster, n_vars), f32),   # partial sum_b prob
    )
    tile_map = lambda p, s: (0, p * n_steps + s)
    out_map = lambda p, s: (p, 0, 0)
    const_map = lambda p, s: (0, 0)

    adapt_p, num_p, psum_p = pl.pallas_call(
        kernel,
        out_shape=out_shape,
        grid=(n_par, n_steps),
        in_specs=[
            pl.BlockSpec((seq_len, tr), tile_map),              # x_t
            pl.BlockSpec((d_model, seq_len), const_map),        # w (bf16)
            pl.BlockSpec((d_model, 1), const_map),              # bias (f32)
            pl.BlockSpec((n_cluster, d_model), const_map),      # cn (bf16)
            pl.BlockSpec((n_cluster, tr), tile_map),            # rn (bf16)
            pl.BlockSpec((n_vars, tr), tile_map),               # selector (f32)
        ],
        out_specs=(
            pl.BlockSpec((1, n_cluster, d_model), out_map),
            pl.BlockSpec((1, n_cluster, 1), out_map),
            pl.BlockSpec((1, n_cluster, n_vars), out_map),
        ),
        compiler_params=pltpu.CompilerParams(
            dimension_semantics=("parallel", "arbitrary"),
            vmem_limit_bytes=vmem_limit),
    )(x_t, w_b, b_col, cn, rn_t, sel)

    # Tiny epilogue: combine the per-core partials, final sinkhorn + update.
    adapt = jnp.sum(adapt_p, axis=0)                 # [nc, d_model]
    num = jnp.sum(num_p, axis=0)                     # [nc, 1]
    psum = jnp.sum(psum_p, axis=0)                   # [nc, n_vars]
    ce_out = ce + adapt / (num + 1e-6)
    prob_mean = psum.T / bs                          # [n_vars, nc]
    qm = jnp.exp(prob_mean / epsilon)
    prob_avg = qm / jnp.sum(qm, axis=1, keepdims=True)
    return prob_avg, ce_out


# ----------------------------------------------------------------------------
# Pure-JAX reference (mirror of the PyTorch forward, same noise; uses the same
# relaxed precision as the kernel: bf16 MXU operands, bf16-streamed rn).
# ----------------------------------------------------------------------------
def reference_forward(x, cluster_emb, w, b, noise, epsilon=0.05, temp=0.07):
    bs, seq_len, n_vars = x.shape
    n_cluster, d_model = cluster_emb.shape
    f32, bf16 = jnp.float32, jnp.bfloat16
    x2d = jnp.transpose(x, (0, 2, 1)).reshape(-1, seq_len).astype(f32)
    x_emb = jnp.dot(x2d.astype(bf16), w.astype(f32).astype(bf16).T,
                    preferred_element_type=f32) + b

    def l2n(v):
        return v / jnp.maximum(jnp.linalg.norm(v, axis=1, keepdims=True), 1e-12)

    prob = jnp.dot(l2n(x_emb).astype(bf16),
                   l2n(cluster_emb.astype(f32)).astype(bf16).T,
                   preferred_element_type=f32)
    prob3 = prob.reshape(bs, n_vars, n_cluster)

    def sink(o):
        q = jnp.exp(o / epsilon)
        return q / jnp.sum(q, axis=1, keepdims=True)

    prob_temp = sink(prob)
    # mirror the kernel's bf16 HBM streaming of the logistic noise
    rn = (jnp.log(noise) - jnp.log(1.0 - noise)).astype(bf16).astype(f32)
    logit = jnp.log(prob_temp + 1e-10) - jnp.log(1.0 - prob_temp + 1e-10)
    mask = jax.nn.sigmoid((logit + rn) / temp)
    num_var_pc = jnp.sum(mask, axis=0)
    adapt = jnp.dot(x_emb.T.astype(bf16), mask.astype(bf16),
                    preferred_element_type=f32) / (num_var_pc + 1e-6)
    ce_out = cluster_emb.astype(f32) + adapt.T
    prob_avg = sink(jnp.mean(prob3, axis=0))
    return prob_avg, ce_out


# ----------------------------------------------------------------------------
# Demo / correctness check
# ----------------------------------------------------------------------------
if __name__ == "__main__":
    def run_case(bs, seq_len, n_vars, n_cluster, d_model, rows_per_step=None):
        bn = bs * n_vars
        key = jax.random.PRNGKey(0)
        kx, kw, kb, kc, kn = jax.random.split(key, 5)
        wb = 1.0 / math.sqrt(seq_len)
        w = jax.random.uniform(kw, (d_model, seq_len), jnp.float32, -wb, wb)
        b = jax.random.uniform(kb, (d_model,), jnp.float32, -wb, wb)
        cb = 1.0 / math.sqrt(d_model)
        cluster_emb = jax.random.uniform(kc, (n_cluster, d_model), jnp.float32,
                                         -cb, cb)
        x = jax.random.normal(kx, (bs, seq_len, n_vars), jnp.float32)
        noise = jax.random.uniform(kn, (bn, n_cluster), jnp.float32,
                                   1e-10, 1.0 - 1e-10)

        pa, ceo = cluster_assigner_forward(x, cluster_emb, w, b, noise,
                                           rows_per_step=rows_per_step)
        jax.block_until_ready((pa, ceo))
        ref_pa, ref_ceo = reference_forward(x, cluster_emb, w, b, noise)

        assert pa.shape == (n_vars, n_cluster)
        assert ceo.shape == (n_cluster, d_model)
        # tolerance covers bf16 MXU operands, bf16 rn streaming, approx recip
        tol = 1e-2
        assert jnp.allclose(pa, ref_pa, rtol=tol, atol=tol), (
            float(jnp.max(jnp.abs(pa - ref_pa))))
        assert jnp.allclose(ceo, ref_ceo, rtol=tol, atol=tol), (
            float(jnp.max(jnp.abs(ceo - ref_ceo))))

    # 1) tiny shape: single full-rows tile (bn = 32 <= 128 path)
    run_case(bs=4, seq_len=16, n_vars=8, n_cluster=4, d_model=32)
    # 2) bn = 384: auto tiling -> two 256-row tiles (padded), parallel axis = 2
    run_case(bs=48, seq_len=16, n_vars=8, n_cluster=4, d_model=32)
    # 3) forced 128-row tiles -> 4 tiles = 2 parallel x 2 accumulation steps,
    #    with 128 fully-masked pad rows
    run_case(bs=48, seq_len=16, n_vars=8, n_cluster=4, d_model=32,
             rows_per_step=128)

    print("KERNEL_OK")
</pallas_src>

<mosaic_0001>
module attributes {stable_mosaic.version = 11 : i64} {
  func.func @_cluster_assigner_kernel(%arg0: i32, %arg1: i32, %arg2: memref<16x32xbf16, #tpu.memory_space<vmem>>, %arg3: memref<32x16xbf16, #tpu.memory_space<vmem>>, %arg4: memref<32x1xf32, #tpu.memory_space<vmem>>, %arg5: memref<4x32xbf16, #tpu.memory_space<vmem>>, %arg6: memref<4x32xbf16, #tpu.memory_space<vmem>>, %arg7: memref<8x32xf32, #tpu.memory_space<vmem>>, %arg8: memref<1x4x32xf32, #tpu.memory_space<vmem>>, %arg9: memref<1x4x1xf32, #tpu.memory_space<vmem>>, %arg10: memref<1x4x8xf32, #tpu.memory_space<vmem>>) attributes {dimension_semantics = [#tpu.dimension_semantics<parallel>, #tpu.dimension_semantics<arbitrary>], iteration_bounds = array<i64: 1, 1>, scalar_prefetch = 0 : i64, scratch_operands = 0 : i64, tpu.core_type = #tpu.core_type<tc>, window_params = [{transform_indices = @transform_0, window_bounds = array<i64: 16, 32>}, {pipeline_mode = #tpu.pipeline_mode<synchronous>, transform_indices = @transform_1, window_bounds = array<i64: 32, 16>}, {pipeline_mode = #tpu.pipeline_mode<synchronous>, transform_indices = @transform_2, window_bounds = array<i64: 32, 1>}, {pipeline_mode = #tpu.pipeline_mode<synchronous>, transform_indices = @transform_3, window_bounds = array<i64: 4, 32>}, {transform_indices = @transform_4, window_bounds = array<i64: 4, 32>}, {transform_indices = @transform_5, window_bounds = array<i64: 8, 32>}, {transform_indices = @transform_6, window_bounds = array<i64: 1, 4, 32>}, {transform_indices = @transform_7, window_bounds = array<i64: 1, 4, 1>}, {transform_indices = @transform_8, window_bounds = array<i64: 1, 4, 8>}]} {
    %c0_i32 = arith.constant 0 : i32
    %0 = arith.cmpi eq, %arg1, %c0_i32 : i32
    %1 = arith.extui %0 : i1 to i32
    %c0_i32_0 = arith.constant 0 : i32
    %2 = arith.cmpi ne, %1, %c0_i32_0 : i32
    scf.if %2 {
      %cst_44 = arith.constant 0.000000e+00 : f32
      %76 = vector.broadcast %cst_44 : f32 to vector<1x4x32xf32>
      %c0_45 = arith.constant 0 : index
      %c0_46 = arith.constant 0 : index
      %c0_47 = arith.constant 0 : index
      %77 = vector.load %arg8[%c0_45, %c0_46, %c0_47] : memref<1x4x32xf32, #tpu.memory_space<vmem>>, vector<1x4x32xf32>
      tpu.vector_store %arg8[%c0_45, %c0_46, %c0_47], %76 {strides = array<i32>} : memref<1x4x32xf32, #tpu.memory_space<vmem>>, vector<1x4x32xf32>,
      %cst_48 = arith.constant 0.000000e+00 : f32
      %78 = vector.broadcast %cst_48 : f32 to vector<1x4x1xf32>
      %c0_49 = arith.constant 0 : index
      %c0_50 = arith.constant 0 : index
      %c0_51 = arith.constant 0 : index
      %79 = vector.load %arg9[%c0_49, %c0_50, %c0_51] : memref<1x4x1xf32, #tpu.memory_space<vmem>>, vector<1x4x1xf32>
      tpu.vector_store %arg9[%c0_49, %c0_50, %c0_51], %78 {strides = array<i32>} : memref<1x4x1xf32, #tpu.memory_space<vmem>>, vector<1x4x1xf32>,
      %cst_52 = arith.constant 0.000000e+00 : f32
      %80 = vector.broadcast %cst_52 : f32 to vector<1x4x8xf32>
      %c0_53 = arith.constant 0 : index
      %c0_54 = arith.constant 0 : index
      %c0_55 = arith.constant 0 : index
      %81 = vector.load %arg10[%c0_53, %c0_54, %c0_55] : memref<1x4x8xf32, #tpu.memory_space<vmem>>, vector<1x4x8xf32>
      tpu.vector_store %arg10[%c0_53, %c0_54, %c0_55], %80 {strides = array<i32>} : memref<1x4x8xf32, #tpu.memory_space<vmem>>, vector<1x4x8xf32>,
    } else {
    }
    %c0 = arith.constant 0 : index
    %c0_1 = arith.constant 0 : index
    %3 = vector.load %arg3[%c0, %c0_1] : memref<32x16xbf16, #tpu.memory_space<vmem>>, vector<32x16xbf16>
    %c0_2 = arith.constant 0 : index
    %c0_3 = arith.constant 0 : index
    %4 = vector.load %arg2[%c0_2, %c0_3] : memref<16x32xbf16, #tpu.memory_space<vmem>>, vector<16x32xbf16>
    %cst = arith.constant dense<0.000000e+00> : vector<32x32xf32>
    %5 = tpu.matmul %3, %4, %cst {dimension_numbers = #tpu.dot_dimension_numbers<[1], [0], [0], [1], [0, 0, 1, 1], [], []>} : vector<32x16xbf16>, vector<16x32xbf16>, vector<32x32xf32> -> vector<32x32xf32>
    %c0_4 = arith.constant 0 : index
    %c0_5 = arith.constant 0 : index
    %6 = vector.load %arg4[%c0_4, %c0_5] : memref<32x1xf32, #tpu.memory_space<vmem>>, vector<32x1xf32>
    %7 = vector.broadcast %6 : vector<32x1xf32> to vector<32x32xf32>
    %8 = arith.addf %5, %7 : vector<32x32xf32>
    %9 = arith.mulf %8, %8 : vector<32x32xf32>
    %cst_6 = arith.constant dense<0.000000e+00> : vector<32xf32>
    %10 = vector.multi_reduction <add>, %9, %cst_6 [0] : vector<32x32xf32> to vector<32xf32>
    %11 = vector.shape_cast %10 : vector<32xf32> to vector<1x32xf32>
    %cst_7 = arith.constant 1.000000e-24 : f32
    %12 = vector.broadcast %cst_7 : f32 to vector<1x32xf32>
    %13 = arith.maximumf %11, %12 : vector<1x32xf32>
    %14 = math.rsqrt %13 : vector<1x32xf32>
    %15 = vector.broadcast %14 : vector<1x32xf32> to vector<32x32xf32>
    %16 = arith.mulf %8, %15 : vector<32x32xf32>
    %c0_8 = arith.constant 0 : index
    %c0_9 = arith.constant 0 : index
    %17 = vector.load %arg5[%c0_8, %c0_9] : memref<4x32xbf16, #tpu.memory_space<vmem>>, vector<4x32xbf16>
    %18 = arith.truncf %16 : vector<32x32xf32> to vector<32x32xbf16>
    %cst_10 = arith.constant dense<0.000000e+00> : vector<4x32xf32>
    %19 = tpu.matmul %17, %18, %cst_10 {dimension_numbers = #tpu.dot_dimension_numbers<[1], [0], [0], [1], [0, 0, 1, 1], [], []>} : vector<4x32xbf16>, vector<32x32xbf16>, vector<4x32xf32> -> vector<4x32xf32>
    %cst_11 = arith.constant 2.000000e+01 : f32
    %20 = vector.broadcast %cst_11 : f32 to vector<4x32xf32>
    %21 = arith.mulf %19, %20 : vector<4x32xf32>
    %22 = math.exp %21 : vector<4x32xf32>
    %cst_12 = arith.constant dense<0.000000e+00> : vector<32xf32>
    %23 = vector.multi_reduction <add>, %22, %cst_12 [0] : vector<4x32xf32> to vector<32xf32>
    %24 = vector.shape_cast %23 : vector<32xf32> to vector<1x32xf32>
    %25 = tpu.reciprocal %24 {approx = true} : vector<1x32xf32> -> vector<1x32xf32>
    %26 = arith.mulf %24, %25 : vector<1x32xf32>
    %cst_13 = arith.constant 2.000000e+00 : f32
    %27 = vector.broadcast %cst_13 : f32 to vector<1x32xf32>
    %28 = arith.subf %27, %26 : vector<1x32xf32>
    %29 = arith.mulf %25, %28 : vector<1x32xf32>
    %30 = vector.broadcast %29 : vector<1x32xf32> to vector<4x32xf32>
    %31 = arith.mulf %22, %30 : vector<4x32xf32>
    %cst_14 = arith.constant 1.000000e-10 : f32
    %32 = vector.broadcast %cst_14 : f32 to vector<4x32xf32>
    %33 = arith.addf %31, %32 : vector<4x32xf32>
    %34 = math.log %33 : vector<4x32xf32>
    %cst_15 = arith.constant 1.000000e+00 : f32
    %35 = vector.broadcast %cst_15 : f32 to vector<4x32xf32>
    %36 = arith.subf %35, %31 : vector<4x32xf32>
    %cst_16 = arith.constant 1.000000e-10 : f32
    %37 = vector.broadcast %cst_16 : f32 to vector<4x32xf32>
    %38 = arith.addf %36, %37 : vector<4x32xf32>
    %39 = math.log %38 : vector<4x32xf32>
    %40 = arith.subf %34, %39 : vector<4x32xf32>
    %c0_17 = arith.constant 0 : index
    %c0_18 = arith.constant 0 : index
    %41 = vector.load %arg6[%c0_17, %c0_18] : memref<4x32xbf16, #tpu.memory_space<vmem>>, vector<4x32xbf16>
    %42 = arith.extf %41 : vector<4x32xbf16> to vector<4x32xf32>
    %43 = arith.addf %40, %42 : vector<4x32xf32>
    %cst_19 = arith.constant 14.2857141 : f32
    %44 = vector.broadcast %cst_19 : f32 to vector<4x32xf32>
    %45 = arith.mulf %43, %44 : vector<4x32xf32>
    %46 = arith.negf %45 : vector<4x32xf32>
    %47 = math.exp %46 : vector<4x32xf32>
    %cst_20 = arith.constant 1.000000e+00 : f32
    %48 = vector.broadcast %cst_20 : f32 to vector<4x32xf32>
    %49 = arith.addf %48, %47 : vector<4x32xf32>
    %50 = arith.divf %48, %49 : vector<4x32xf32>
    %c0_21 = arith.constant 0 : index
    %c0_22 = arith.constant 0 : index
    %c0_23 = arith.constant 0 : index
    %51 = vector.load %arg8[%c0_21, %c0_22, %c0_23] : memref<1x4x32xf32, #tpu.memory_space<vmem>>, vector<1x4x32xf32>
    %52 = vector.shape_cast %51 : vector<1x4x32xf32> to vector<4x32xf32>
    %53 = arith.truncf %50 : vector<4x32xf32> to vector<4x32xbf16>
    %54 = arith.truncf %8 : vector<32x32xf32> to vector<32x32xbf16>
    %cst_24 = arith.constant dense<0.000000e+00> : vector<4x32xf32>
    %55 = tpu.matmul %53, %54, %cst_24 {dimension_numbers = #tpu.dot_dimension_numbers<[1], [1], [0], [0], [0, 0, 1, 0], [], []>} : vector<4x32xbf16>, vector<32x32xbf16>, vector<4x32xf32> -> vector<4x32xf32>
    %56 = arith.addf %52, %55 : vector<4x32xf32>
    %c0_25 = arith.constant 0 : index
    %c0_26 = arith.constant 0 : index
    %c0_27 = arith.constant 0 : index
    %57 = vector.load %arg8[%c0_25, %c0_26, %c0_27] : memref<1x4x32xf32, #tpu.memory_space<vmem>>, vector<1x4x32xf32>
    %58 = vector.shape_cast %57 : vector<1x4x32xf32> to vector<4x32xf32>
    %59 = vector.shape_cast %56 : vector<4x32xf32> to vector<1x4x32xf32>
    tpu.vector_store %arg8[%c0_25, %c0_26, %c0_27], %59 {strides = array<i32>} : memref<1x4x32xf32, #tpu.memory_space<vmem>>, vector<1x4x32xf32>,
    %c0_28 = arith.constant 0 : index
    %c0_29 = arith.constant 0 : index
    %c0_30 = arith.constant 0 : index
    %60 = vector.load %arg9[%c0_28, %c0_29, %c0_30] : memref<1x4x1xf32, #tpu.memory_space<vmem>>, vector<1x4x1xf32>
    %61 = vector.shape_cast %60 : vector<1x4x1xf32> to vector<4x1xf32>
    %cst_31 = arith.constant dense<0.000000e+00> : vector<4xf32>
    %62 = vector.multi_reduction <add>, %50, %cst_31 [1] : vector<4x32xf32> to vector<4xf32>
    %63 = vector.shape_cast %62 : vector<4xf32> to vector<4x1xf32>
    %64 = arith.addf %61, %63 : vector<4x1xf32>
    %c0_32 = arith.constant 0 : index
    %c0_33 = arith.constant 0 : index
    %c0_34 = arith.constant 0 : index
    %65 = vector.load %arg9[%c0_32, %c0_33, %c0_34] : memref<1x4x1xf32, #tpu.memory_space<vmem>>, vector<1x4x1xf32>
    %66 = vector.shape_cast %65 : vector<1x4x1xf32> to vector<4x1xf32>
    %67 = vector.shape_cast %64 : vector<4x1xf32> to vector<1x4x1xf32>
    tpu.vector_store %arg9[%c0_32, %c0_33, %c0_34], %67 {strides = array<i32>} : memref<1x4x1xf32, #tpu.memory_space<vmem>>, vector<1x4x1xf32>,
    %c0_35 = arith.constant 0 : index
    %c0_36 = arith.constant 0 : index
    %c0_37 = arith.constant 0 : index
    %68 = vector.load %arg10[%c0_35, %c0_36, %c0_37] : memref<1x4x8xf32, #tpu.memory_space<vmem>>, vector<1x4x8xf32>
    %69 = vector.shape_cast %68 : vector<1x4x8xf32> to vector<4x8xf32>
    %c0_38 = arith.constant 0 : index
    %c0_39 = arith.constant 0 : index
    %70 = vector.load %arg7[%c0_38, %c0_39] : memref<8x32xf32, #tpu.memory_space<vmem>>, vector<8x32xf32>
    %cst_40 = arith.constant dense<0.000000e+00> : vector<4x8xf32>
    %71 = tpu.matmul %19, %70, %cst_40 {dimension_numbers = #tpu.dot_dimension_numbers<[1], [1], [0], [0], [0, 0, 1, 0], [], []>} : vector<4x32xf32>, vector<8x32xf32>, vector<4x8xf32> -> vector<4x8xf32>
    %72 = arith.addf %69, %71 : vector<4x8xf32>
    %c0_41 = arith.constant 0 : index
    %c0_42 = arith.constant 0 : index
    %c0_43 = arith.constant 0 : index
    %73 = vector.load %arg10[%c0_41, %c0_42, %c0_43] : memref<1x4x8xf32, #tpu.memory_space<vmem>>, vector<1x4x8xf32>
    %74 = vector.shape_cast %73 : vector<1x4x8xf32> to vector<4x8xf32>
    %75 = vector.shape_cast %72 : vector<4x8xf32> to vector<1x4x8xf32>
    tpu.vector_store %arg10[%c0_41, %c0_42, %c0_43], %75 {strides = array<i32>} : memref<1x4x8xf32, #tpu.memory_space<vmem>>, vector<1x4x8xf32>,
    return
  }
  func.func @transform_0(%arg0: i32, %arg1: i32) -> (i32, i32) {
    %c1_i32 = arith.constant 1 : i32
    %0 = arith.muli %arg0, %c1_i32 : i32
    %1 = arith.addi %0, %arg1 : i32
    %c0_i32 = arith.constant 0 : i32
    %c0_i32_0 = arith.constant 0 : i32
    return %c0_i32, %1 : i32, i32
  }
  func.func @transform_1(%arg0: i32, %arg1: i32) -> (i32, i32) {
    %c0_i32 = arith.constant 0 : i32
    %c0_i32_0 = arith.constant 0 : i32
    %c0_i32_1 = arith.constant 0 : i32
    return %c0_i32, %c0_i32_0 : i32, i32
  }
  func.func @transform_2(%arg0: i32, %arg1: i32) -> (i32, i32) {
    %c0_i32 = arith.constant 0 : i32
    %c0_i32_0 = arith.constant 0 : i32
    %c0_i32_1 = arith.constant 0 : i32
    return %c0_i32, %c0_i32_0 : i32, i32
  }
  func.func @transform_3(%arg0: i32, %arg1: i32) -> (i32, i32) {
    %c0_i32 = arith.constant 0 : i32
    %c0_i32_0 = arith.constant 0 : i32
    %c0_i32_1 = arith.constant 0 : i32
    return %c0_i32, %c0_i32_0 : i32, i32
  }
  func.func @transform_4(%arg0: i32, %arg1: i32) -> (i32, i32) {
    %c1_i32 = arith.constant 1 : i32
    %0 = arith.muli %arg0, %c1_i32 : i32
    %1 = arith.addi %0, %arg1 : i32
    %c0_i32 = arith.constant 0 : i32
    %c0_i32_0 = arith.constant 0 : i32
    return %c0_i32, %1 : i32, i32
  }
  func.func @transform_5(%arg0: i32, %arg1: i32) -> (i32, i32) {
    %c1_i32 = arith.constant 1 : i32
    %0 = arith.muli %arg0, %c1_i32 : i32
    %1 = arith.addi %0, %arg1 : i32
    %c0_i32 = arith.constant 0 : i32
    %c0_i32_0 = arith.constant 0 : i32
    return %c0_i32, %1 : i32, i32
  }
  func.func @transform_6(%arg0: i32, %arg1: i32) -> (i32, i32, i32) {
    %c0_i32 = arith.constant 0 : i32
    %c0_i32_0 = arith.constant 0 : i32
    %c0_i32_1 = arith.constant 0 : i32
    return %arg0, %c0_i32, %c0_i32_0 : i32, i32, i32
  }
  func.func @transform_7(%arg0: i32, %arg1: i32) -> (i32, i32, i32) {
    %c0_i32 = arith.constant 0 : i32
    %c0_i32_0 = arith.constant 0 : i32
    %c0_i32_1 = arith.constant 0 : i32
    return %arg0, %c0_i32, %c0_i32_0 : i32, i32, i32
  }
  func.func @transform_8(%arg0: i32, %arg1: i32) -> (i32, i32, i32) {
    %c0_i32 = arith.constant 0 : i32
    %c0_i32_0 = arith.constant 0 : i32
    %c0_i32_1 = arith.constant 0 : i32
    return %arg0, %c0_i32, %c0_i32_0 : i32, i32, i32
  }
}

</mosaic_0001>

<bundles_post_ra>
// kernel: tpu_custom_call.1
= control target key start
LH: loop header
LB: loop body
LE: loop exit
PB: predicated region body
PF: predicated region fallthrough
CT: control target
= control target key end

     0   :  { %14 = vsyncpa [#allocation3], 0  ;;  %s1028_s0 = inlined_call_operand.hbm [shape: bf16[16,32], index: 0, kind: input, shape index: {}]   ;;  %s1029_s1 = inlined_call_operand.hbm [shape: bf16[32,16], index: 1, kind: input, shape index: {}]   ;;  %s1030_s2 = inlined_call_operand.hbm [shape: f32[32,1], index: 2, kind: input, shape index: {}]   ;;  %s1031_s3 = inlined_call_operand.hbm [shape: bf16[4,32], index: 3, kind: input, shape index: {}]   ;;  %s1032_s4 = inlined_call_operand.hbm [shape: bf16[4,32], index: 4, kind: input, shape index: {}]   ;;  %s1033_s5 = inlined_call_operand.hbm [shape: f32[8,32], index: 5, kind: input, shape index: {}]   ;;  %s1034_s6 = inlined_call_operand.hbm [shape: f32[1,4,32], index: 6, kind: output, shape index: {0}]   ;;  %s1035_s7 = inlined_call_operand.hbm [shape: f32[1,4,1], index: 7, kind: output, shape index: {1}]   ;;  %s1036_s8 = inlined_call_operand.hbm [shape: f32[1,4,8], index: 8, kind: output, shape index: {2}]  }
   0x1   :  { %15 = vsyncpa [#allocation6], 0 }
   0x2   :  { %16 = vsyncpa [#allocation9], 0 }
   0x3   :  { %17 = vsyncpa [#allocation12], 0 }
   0x4   :  { %18 = vsyncpa [#allocation4], 0 }
   0x5   :  { %19 = vsyncpa [#allocation15], 0  ;;  %s814_s27 = smov [#allocation5]   ;;  %s815_s29 = smov [#allocation8]  }
   0x6   :  { %s40_s28 = sshll.u32 %s814_s27, 4  ;;  %s65_s30 = sshll.u32 %s815_s29, 4  ;;  %s41_s28 = int_to_ptr.vmem [resolvable:$true] %s40_s28  ;;  %s66_s30 = int_to_ptr.vmem [resolvable:$true] %s65_s30 }
   0x7   :  { %s604_s11 = scalar_lea.hbm %s1029_s1, 256 }
   0x8   :  { %p605_p0 = scmp.ne.s32.totalorder %s1029_s1, %s604_s11  ;;  %p608_p1 = scmp.lt.u32.totalorder %s604_s11, %s1029_s1 }
   0xa   :  { %p610_p2 = pnand %p608_p1, %p605_p0 }
   0xc   :  { %613 = shalt.err (!%p610_p2)
}
   0xd   :  { %s614_s16 = scalar_lea.vmem %s41_s28, 256  ;;  %p619_p4 = scmp.lt.s32.totalorder %s41_s28, %s41_s28 }
   0xe   :  { %p615_p3 = scmp.ne.s32.totalorder %s41_s28, %s614_s16  ;;  %p620_p5 = scmp.lt.s32.totalorder %s614_s16, %s614_s16 }
  0x10   :  { %p621_p6 = por %p620_p5, %p619_p4 }
  0x12   :  { %p622_p7 = pnand %p621_p6, %p615_p3 }
  0x14   :  { %625 = shalt.err (!%p622_p7)
}
  0x15   :  { %s816_s17 = smov 64   ;;  %s817_s18 = smov 4  }
  0x16   :  { %46 = dma.hbm_to_vmem [thread:$0]  %s1029_s1, 256, %s41_s28, [#allocation6], %s816_s17, %s816_s17, %s817_s18  }
  0x17   :  { %s626_s23 = scalar_lea.hbm %s1031_s3, 32 }
  0x18   :  { %p627_p8 = scmp.ne.s32.totalorder %s1031_s3, %s626_s23  ;;  %p630_p9 = scmp.lt.u32.totalorder %s626_s23, %s1031_s3 }
  0x1a   :  { %p632_p10 = pnand %p630_p9, %p627_p8 }
  0x1c   :  { %635 = shalt.err (!%p632_p10)
}
  0x1d   :  { %s636_s29 = scalar_lea.vmem %s66_s30, 32  ;;  %p641_p12 = scmp.lt.s32.totalorder %s66_s30, %s66_s30 }
  0x1e   :  { %p637_p11 = scmp.ne.s32.totalorder %s66_s30, %s636_s29  ;;  %p642_p13 = scmp.lt.s32.totalorder %s636_s29, %s636_s29 }
  0x20   :  { %p643_p0 = por %p642_p13, %p641_p12 }
  0x22   :  { %p644_p1 = pnand %p643_p0, %p637_p11 }
  0x24   :  { %647 = shalt.err (!%p644_p1)
}
  0x25   :  { %68 = dma.hbm_to_vmem [thread:$0]  %s1031_s3, 32, %s66_s30, [#allocation9]  }
  0x26   :  { %s818_s9 = smov [#allocation2]   ;;  %s819_s11 = smov [#allocation7]  }
  0x27   :  { %s28_s10 = sshll.u32 %s818_s9, 4  ;;  %s52_s12 = sshll.u32 %s819_s11, 4  ;;  %s29_s10 = int_to_ptr.vmem [resolvable:$true] %s28_s10  ;;  %s902_s12 = int_to_ptr.vmem [resolvable:$true] %s52_s12 }
  0x28   :  { %s648_s15 = scalar_lea.hbm %s1028_s0, 128 }
  0x29   :  { %p649_p2 = scmp.ne.s32.totalorder %s1028_s0, %s648_s15  ;;  %p652_p3 = scmp.lt.u32.totalorder %s648_s15, %s1028_s0 }
  0x2b   :  { %p654_p4 = pnand %p652_p3, %p649_p2 }
  0x2d   :  { %657 = shalt.err (!%p654_p4)
}
  0x2e   :  { %s658_s3 = scalar_lea.vmem %s29_s10, 128  ;;  %p663_p6 = scmp.lt.s32.totalorder %s29_s10, %s29_s10 }
  0x2f   :  { %p659_p5 = scmp.ne.s32.totalorder %s29_s10, %s658_s3  ;;  %p664_p7 = scmp.lt.s32.totalorder %s658_s3, %s658_s3 }
  0x31   :  { %p665_p8 = por %p664_p7, %p663_p6 }
  0x33   :  { %p666_p9 = pnand %p665_p8, %p659_p5 }
  0x35   :  { %669 = shalt.err (!%p666_p9)
}
  0x36   :  { %34 = dma.hbm_to_vmem [thread:$0]  %s1028_s0, 128, %s29_s10, [#allocation3], %s816_s17, %s816_s17, %s817_s18  }
  0x37   :  { %s670_s25 = scalar_lea.hbm %s1030_s2, 512 }
  0x38   :  { %p671_p10 = scmp.ne.s32.totalorder %s1030_s2, %s670_s25  ;;  %p674_p11 = scmp.lt.u32.totalorder %s670_s25, %s1030_s2 }
  0x3a   :  { %p676_p12 = pnand %p674_p11, %p671_p10 }
  0x3c   :  { %679 = shalt.err (!%p676_p12)
}
  0x3d   :  { %s680_s28 = scalar_lea.vmem %s902_s12, 512  ;;  %p685_p0 = scmp.lt.s32.totalorder %s902_s12, %s902_s12 }
  0x3e   :  { %p681_p13 = scmp.ne.s32.totalorder %s902_s12, %s680_s28  ;;  %p686_p1 = scmp.lt.s32.totalorder %s680_s28, %s680_s28 }
  0x40   :  { %p687_p2 = por %p686_p1, %p685_p0 }
  0x42   :  { %p688_p3 = pnand %p687_p2, %p681_p13 }
  0x44   :  { %691 = shalt.err (!%p688_p3)
}
  0x45   :  { %s820_s0 = smov 128   ;;  %s821_s17 = smov 8  }
  0x46   :  { %58 = dma.hbm_to_vmem [thread:$0]  %s1030_s2, 512, %s902_s12, [#allocation6], %s820_s0, %s820_s0, %s821_s17  }
  0x47   :  { %s822_s10 = smov [#allocation10]   ;;  %s823_s13 = smov [#allocation11]  }
  0x48   :  { %s78_s11 = sshll.u32 %s822_s10, 4  ;;  %s91_s14 = sshll.u32 %s823_s13, 4  ;;  %s79_s11 = int_to_ptr.vmem [resolvable:$true] %s78_s11  ;;  %s92_s14 = int_to_ptr.vmem [resolvable:$true] %s91_s14 }
  0x49   :  { %s692_s19 = scalar_lea.hbm %s1032_s4, 32 }
  0x4a   :  { %p693_p4 = scmp.ne.s32.totalorder %s1032_s4, %s692_s19  ;;  %p696_p5 = scmp.lt.u32.totalorder %s692_s19, %s1032_s4 }
  0x4c   :  { %p698_p6 = pnand %p696_p5, %p693_p4 }
  0x4e   :  { %701 = shalt.err (!%p698_p6)
}
  0x4f   :  { %s702_s2 = scalar_lea.vmem %s79_s11, 32  ;;  %p707_p8 = scmp.lt.s32.totalorder %s79_s11, %s79_s11 }
  0x50   :  { %p703_p7 = scmp.ne.s32.totalorder %s79_s11, %s702_s2  ;;  %p708_p9 = scmp.lt.s32.totalorder %s702_s2, %s702_s2 }
  0x52   :  { %p709_p10 = por %p708_p9, %p707_p8 }
  0x54   :  { %p710_p11 = pnand %p709_p10, %p703_p7 }
  0x56   :  { %713 = shalt.err (!%p710_p11)
}
  0x57   :  { %81 = dma.hbm_to_vmem [thread:$0]  %s1032_s4, 32, %s79_s11, [#allocation9]  }
  0x58   :  { %s714_s25 = scalar_lea.hbm %s1033_s5, 128 }
  0x59   :  { %p715_p12 = scmp.ne.s32.totalorder %s1033_s5, %s714_s25  ;;  %p718_p13 = scmp.lt.u32.totalorder %s714_s25, %s1033_s5 }
  0x5b   :  { %p720_p0 = pnand %p718_p13, %p715_p12 }
  0x5d   :  { %723 = shalt.err (!%p720_p0)
}
  0x5e   :  { %s724_s28 = scalar_lea.vmem %s92_s14, 128  ;;  %p729_p2 = scmp.lt.s32.totalorder %s92_s14, %s92_s14 }
  0x5f   :  { %p725_p1 = scmp.ne.s32.totalorder %s92_s14, %s724_s28  ;;  %p730_p3 = scmp.lt.s32.totalorder %s724_s28, %s724_s28 }
  0x61   :  { %p731_p4 = por %p730_p3, %p729_p2 }
  0x63   :  { %p732_p5 = pnand %p731_p4, %p725_p1 }
  0x65   :  { %735 = shalt.err (!%p732_p5)
}
  0x66   :  { %94 = dma.hbm_to_vmem [thread:$0]  %s1033_s5, 128, %s92_s14, [#allocation12]  }
  0x67   :  { %802 = dma.done.wait [#allocation3], 128  }
  0x68   :  { %803 = vsyncadd [#allocation3], 4294967168 }
  0x69   :  { %804 = dma.done.wait [#allocation6], 768  }
  0x6a   :  { %805 = vsyncadd [#allocation6], 4294966528 }
  0x6b   :  { %806 = dma.done.wait [#allocation9], 64  }
  0x6c   :  { %807 = vsyncadd [#allocation9], 4294967232 }
  0x6d   :  { %808 = dma.done.wait [#allocation12], 128  }
  0x6e   :  { %809 = vsyncadd [#allocation12], 4294967168  ;;  %v824_v0 = vmov 0   ;;  %v587_v1 = vld [vmem:[#allocation2] sm:$0xff]   ;;  %vm173_vm0 = vcmask 130048   ;;  %v588_v2 = vld [vmem:[#allocation5] sm:$0xff]  }
  0x6f   :  { %585 = vset.pattern.permute.xlu0 %v824_v0  ;;  %586 = vset.pattern.permute.xlu1 %v824_v0  ;;  %v589_v3 = vld [vmem:[#allocation5 + $0x8] sm:$0xff]   ;;  %v133_v4 = vld [vmem:[#allocation7] sm:$0xff]  ;;  %v135_v5 = vld [vmem:[#allocation7 + $0x10] sm:$0xff]  ;;  %v825_v8 = vmov 0.0   ;;  %vm826_vm1 = vmmov 0   ;;  %vm233_vm2 = vcmask 261120  }
  0x70   :  { %542 = vmatprep.subr.bf16.mxu1 %v587_v1  ;;  %544 = vmatprep.mubr.msk.bf16.mxu1 %vm173_vm0, %v588_v2  ;;  %v134_v6 = vld [vmem:[#allocation7 + $0x8] sm:$0xff]  ;;  %v136_v7 = vld [vmem:[#allocation7 + $0x18] sm:$0xff]  ;;  %v253_v50 = vld [vmem:[#allocation8] sm:$0x3]  ;;  %vm121_vm3 = vcmask 257024   ;;  %vm125_vm4 = vcmask 60416  }
  0x71   :  { %543 = vmatpush3.bf16.msra.mxu1 %v587_v1  ;;  %139 = vperm.xlu0 %585, %v133_v4   ;;  %v396_v51 = vld [vmem:[#allocation11] sm:$0xff]  ;;  %122 = vst.msk [vmem:[#allocation13] sm:$0xf] %vm121_vm3, %v825_v8  ;;  %vm123_vm5 = vcmask 3072   ;;  %s827_s5 = smov [#allocation14]   ;;  %s828_s18 = smov [#allocation16]  }
  0x72   :  { %149 = vperm.xlu1 %586, %v135_v5   ;;  %556 = vmatprep.subr.bf16.mxu0 %v825_v8  ;;  %126 = vst.msk [vmem:[#allocation16] sm:$0xf] %vm125_vm4, %v825_v8  ;;  %s492_s17 = sshll.u32 %s827_s5, 4  ;;  %s502_s9 = sshll.u32 %s828_s18, 4  ;;  %s493_s17 = int_to_ptr.vmem [resolvable:$true] %s492_s17  ;;  %s503_s9 = int_to_ptr.vmem [resolvable:$true] %s502_s9 }
  0x73   :  { %548 = vmatprep.subr.bf16.mxu1 %v825_v8  ;;  %560 = vmatprep.mubr.msk.bf16.mxu0 %vm826_vm1, %v825_v8  ;;  %124 = vst.msk [vmem:[#allocation14] sm:$0xf] %vm123_vm5, %v825_v8  ;;  %s736_s10 = scalar_lea.vmem %s493_s17, 64  ;;  %p741_p7 = scmp.lt.s32.totalorder %s493_s17, %s493_s17 }
  0x74   :  { %545 = vmatmul.mubr.msk.bf16.vlgmr.msra.gmra.mrb[0].mxu1 %vm173_vm0, %v589_v3  ;;  %p737_p6 = scmp.ne.s32.totalorder %s493_s17, %s736_s10  ;;  %p742_p8 = scmp.lt.s32.totalorder %s736_s10, %s736_s10 }
  0x75   :  { %144 = vperm.xlu0 %585, %v134_v6   ;;  %552 = vmatprep.mubr.msk.bf16.mxu1 %vm826_vm1, %v825_v8 }
  0x76   :  { %154 = vperm.xlu1 %586, %v136_v7   ;;  %p743_p9 = por %p742_p8, %p741_p7 }
  0x78   :  { %p744_p10 = pnand %p743_p9, %p737_p6 }
  0xf0   :  { %v140_v10 = vpop.permute.xlu0 %139 }
  0xf1   :  { %v150_v9 = vpop.permute.xlu1 %149 }
  0xf4   :  { %v145_v17 = vpop.permute.xlu0 %144 }
  0xf5   :  { %v155_v12 = vpop.permute.xlu1 %154 }
 0x147   :  { %v546_v11 = vpop.f32.mrb[0].mxu1 }
 0x148   :  { %v214_v13 = vpop.f32.mrb[1].mxu1  ;;  %v223_v14 = vadd.f32 %v546_v11, %v150_v9 }
 0x149   :  { %v215_v15 = vadd.f32 %v214_v13, %v140_v10  ;;  %v547_v16 = vpop.f32.mrb[2].mxu1 }
 0x14a   :  { %v226_v18 = vadd.f32 %v547_v16, %v155_v12  ;;  %v217_v19 = vpop.f32.mrb[3].mxu1  ;;  %v231_v23 = vmul.f32 %v223_v14, %v223_v14  ;;  %v323_v12 = vld [vmem:[#allocation10] sm:$0x3] }
 0x14b   :  { %v229_v20 = vmul.f32 %v215_v15, %v215_v15  ;;  %v218_v21 = vadd.f32 %v217_v19, %v145_v17  ;;  %v324_v16 = vunpack.c.l.bf16 %v323_v12 }
 0x14c   :  { %v336_v22 = vpack.c.bf16 %v226_v18, %v223_v14  ;;  %v232_v27 = vmul.f32 %v226_v18, %v226_v18  ;;  %v237_v31 = vsel %vm233_vm2, %v231_v23, 0.0 }
 0x14d   :  { %v230_v24 = vmul.f32 %v218_v21, %v218_v21  ;;  %v335_v25 = vpack.c.bf16 %v218_v21, %v215_v15  ;;  %v234_v26 = vsel %vm233_vm2, %v229_v20, 0.0 }
 0x14e   :  { %v239_v33 = vsel %vm233_vm2, %v232_v27, 0.0  ;;  %v344_v36 = vsel %vm233_vm2, %v336_v22, 0 }
 0x14f   :  { %v235_v28 = vsel %vm233_vm2, %v230_v24, 0.0  ;;  %v341_v29 = vsel %vm233_vm2, %v335_v25, 0 }
 0x150   :  { %v236_v30 = vadd.f32 %v235_v28, %v234_v26  ;;  %557 = vmatpush3.bf16.xpose.msra.mxu0 %v341_v29  ;;  %v395_v26 = vld [vmem:[#allocation16] sm:$0xf] }
 0x151   :  { %558 = vmatprep.subr.bf16.mxu0 %v825_v8 }
 0x152   :  { %v238_v32 = vadd.f32 %v237_v31, %v236_v30  ;;  %v388_v30 = vld [vmem:[#allocation14] sm:$0xf] }
 0x154   :  { %v240_v34 = vadd.f32 %v239_v33, %v238_v32 }
 0x156   :  { %v241_v35 = vrot.slane %v240_v34, 4 }
 0x158   :  { %v242_v37 = vadd.f32 %v241_v35, %v240_v34  ;;  %559 = vmatpush3.bf16.xpose.msra.mxu0 %v344_v36 }
 0x15a   :  { %v243_v38 = vrot.slane %v242_v37, 2 }
 0x15c   :  { %v244_v39 = vadd.f32 %v243_v38, %v242_v37 }
 0x15e   :  { %v245_v40 = vrot.slane %v244_v39, 1 }
 0x160   :  { %v246_v41 = vadd.f32 %v245_v40, %v244_v39 }
 0x162   :  { %v247_v42 = vmax.f32 %v246_v41, 1e-24 }
 0x164   :  { %590 = vrsqrt.f32 %v247_v42 }
 0x16e   :  { %v591_v43 = vpop.eup %590 }
 0x16f   :  { %v249_v44 = vmul.f32 %v591_v43, %v215_v15  ;;  %v250_v45 = vmul.f32 %v591_v43, %v218_v21  ;;  %v251_v46 = vmul.f32 %v591_v43, %v223_v14  ;;  %v252_v47 = vmul.f32 %v591_v43, %v226_v18 }
 0x171   :  { %v254_v48 = vpack.c.bf16 %v250_v45, %v249_v44  ;;  %v255_v49 = vpack.c.bf16 %v252_v47, %v251_v46 }
 0x173   :  { %549 = vmatpush3.bf16.msra.mxu1 %v254_v48 }
 0x174   :  { %550 = vmatprep.subr.bf16.mxu1 %v825_v8 }
 0x177   :  { %551 = vmatpush3.bf16.msra.mxu1 %v255_v49 }
 0x178   :  { %564 = vmatprep.subr.mxu1 %v825_v8 }
 0x17a   :  { %553 = vmatmul.mubr.msk.bf16.vlgmr.msra.gmra.mrb[4].mxu1 %vm233_vm2, %v253_v50 }
 0x17b   :  { %566 = vmatprep.mubr.msk.f32.mxu1 %vm826_vm1, %v825_v8 }
 0x180   :  { %565 = vmatpush3.xpose.msk.msra.mxu1 %vm233_vm2, %v396_v51 }
 0x24d   :  { %v293_v52 = vpop.f32.mrb[4].mxu1 }
 0x24e   :  { %v299_v53 = vmul.f32 20.0, %v293_v52  ;;  %v554_v54 = vpop.f32.mrb[5].mxu1  ;;  %567 = vmatmul.mubr.msk.f32.vlgmr.msra.gmra.mrb[8].mxu1 %vm233_vm2, %v293_v52 }
 0x24f   :  { %v296_v55 = vpop.f32.mrb[6].mxu1 }
 0x250   :  { %v300_v56 = vmul.f32 1.442695, %v299_v53  ;;  %v555_v57 = vpop.f32.mrb[7].mxu1 }
 0x252   :  { %592 = vpow2.f32 %v300_v56 }
 0x25c   :  { %v593_v58 = vpop.eup %592 }
 0x25d   :  { %v303_v59 = vsel %vm121_vm3, %v593_v58, 0.0 }
 0x25e   :  { %v304_v60 = vrot.slane %v303_v59, 4 }
 0x260   :  { %v305_v61 = vadd.f32 %v304_v60, %v303_v59 }
 0x262   :  { %v306_v62 = vrot.slane %v305_v61, 2 }
 0x264   :  { %v307_v63 = vadd.f32 %v306_v62, %v305_v61 }
 0x266   :  { %v308_v0 = vrot.slane %v307_v63, 1 }
 0x268   :  { %v309_v1 = vadd.f32 %v308_v0, %v307_v63 }
 0x26a   :  { %594 = vrcp.f32 %v309_v1 }
 0x274   :  { %v595_v2 = vpop.eup %594 }
 0x275   :  { %v311_v3 = vmul.f32 %v595_v2, %v309_v1 }
 0x277   :  { %v312_v4 = vsub.f32 2.0, %v311_v3 }
 0x279   :  { %v313_v5 = vmul.f32 %v595_v2, %v312_v4 }
 0x27b   :  { %v314_v6 = vmul.f32 %v593_v58, %v313_v5 }
 0x27d   :  { %v315_v7 = vadd.f32 1e-10, %v314_v6  ;;  %v318_v9 = vsub.f32 1.0, %v314_v6 }
 0x27f   :  { %596 = vlog2.f32 %v315_v7  ;;  %v319_v10 = vadd.f32 1e-10, %v318_v9 }
 0x281   :  { %598 = vlog2.f32 %v319_v10 }
 0x289   :  { %v597_v11 = vpop.eup %596 }
 0x28a   :  { %v317_v14 = vmul.f32 0.6931472, %v597_v11 }
 0x28b   :  { %v599_v13 = vpop.eup %598 }
 0x28c   :  { %v321_v15 = vmul.f32 0.6931472, %v599_v13 }
 0x28e   :  { %v322_v17 = vsub.f32 %v317_v14, %v321_v15 }
 0x290   :  { %v325_v18 = vadd.f32 %v324_v16, %v322_v17 }
 0x292   :  { %v527_v19 = vmul.f32 -14.285714, %v325_v18 }
 0x294   :  { %v328_v20 = vmul.f32 1.442695, %v527_v19 }
 0x296   :  { %600 = vpow2.f32 %v328_v20 }
 0x2a0   :  { %v601_v21 = vpop.eup %600 }
 0x2a1   :  { %v330_v22 = vadd.f32 1.0, %v601_v21 }
 0x2a3   :  { %602 = vrcp.f32 %v330_v22 }
 0x2ad   :  { %v603_v23 = vpop.eup %602 }
 0x2ae   :  { %v389_v24 = vsel %vm121_vm3, %v603_v23, 0.0  ;;  %v334_v25 = vpack.c.bf16 %v603_v23, %v603_v23 }
 0x2af   :  { %390 = vadd.xlane.f32.xlu0 %v389_v24 }
 0x2b0   :  { %561 = vmatmul.mubr.msk.bf16.vlgmr.msra.gmra.mrb[0].mxu0 %vm233_vm2, %v334_v25 }
 0x321   :  { %v469_v27 = vpop.f32.mrb[8].mxu1 }
 0x322   :  { %v473_v28 = vadd.f32 %v469_v27, %v395_v26  ;;  %v568_v29 = vpop.f32.mrb[9].mxu1 }
 0x324   :  { %475 = vst.msk [vmem:[#allocation16] sm:$0xf] %vm125_vm4, %v473_v28 }
 0x33c   :  { %v391_v31 = vpop.xlane.xlu0 %390 }
 0x33d   :  { %v392_v8 = vadd.f32 %v391_v31, %v388_v30 }
 0x33f   :  { %394 = vst.msk [vmem:[#allocation14] sm:$0xf] %vm123_vm5, %v392_v8 }
 0x340   :  { %747 = shalt.err (!%p744_p10)
}
 0x341   :  { %s748_s14 = scalar_lea.hbm %s1035_s7, 64 }
 0x342   :  { %p749_p11 = scmp.ne.s32.totalorder %s1035_s7, %s748_s14  ;;  %p752_p12 = scmp.lt.u32.totalorder %s748_s14, %s1035_s7 }
 0x344   :  { %p754_p13 = pnand %p752_p12, %p749_p11 }
 0x346   :  { %757 = shalt.err (!%p754_p13)
}
 0x347   :  { %495 = dma.vmem_to_hbm [thread:$0]  %s493_s17, 64, %s1035_s7, [#allocation15]  }
 0x348   :  { %s758_s30 = scalar_lea.vmem %s503_s9, 64  ;;  %p763_p1 = scmp.lt.s32.totalorder %s503_s9, %s503_s9 }
 0x349   :  { %p759_p0 = scmp.ne.s32.totalorder %s503_s9, %s758_s30  ;;  %p764_p2 = scmp.lt.s32.totalorder %s758_s30, %s758_s30 }
 0x34b   :  { %p765_p3 = por %p764_p2, %p763_p1 }
 0x34d   :  { %p766_p4 = pnand %p765_p3, %p759_p0 }
 0x34f   :  { %769 = shalt.err (!%p766_p4)
}
 0x350   :  { %s770_s22 = scalar_lea.hbm %s1036_s8, 64 }
 0x351   :  { %p771_p5 = scmp.ne.s32.totalorder %s1036_s8, %s770_s22  ;;  %p774_p6 = scmp.lt.u32.totalorder %s770_s22, %s1036_s8 }
 0x353   :  { %p776_p7 = pnand %p774_p6, %p771_p5 }
 0x355   :  { %779 = shalt.err (!%p776_p7)
}
 0x356   :  { %505 = dma.vmem_to_hbm [thread:$0]  %s503_s9, 64, %s1036_s8, [#allocation15]   ;;  %v333_v32 = vld [vmem:[#allocation13] sm:$0xf] }
 0x357   :  { %s829_s29 = smov [#allocation13]  }
 0x358   :  { %s482_s1 = sshll.u32 %s829_s29, 4  ;;  %s483_s1 = int_to_ptr.vmem [resolvable:$true] %s482_s1 }
 0x359   :  { %s780_s28 = scalar_lea.vmem %s483_s1, 64  ;;  %p785_p9 = scmp.lt.s32.totalorder %s483_s1, %s483_s1 }
 0x35a   :  { %p781_p8 = scmp.ne.s32.totalorder %s483_s1, %s780_s28  ;;  %p786_p10 = scmp.lt.s32.totalorder %s780_s28, %s780_s28 }
 0x35c   :  { %p787_p11 = por %p786_p10, %p785_p9 }
 0x35e   :  { %p788_p12 = pnand %p787_p11, %p781_p8 }
 0x383   :  { %v380_v33 = vpop.f32.mrb[0].mxu0 }
 0x384   :  { %v386_v34 = vadd.f32 %v380_v33, %v333_v32  ;;  %v562_v35 = vpop.f32.mrb[1].mxu0 }
 0x385   :  { %v383_v36 = vpop.f32.mrb[2].mxu0 }
 0x386   :  { %387 = vst.msk [vmem:[#allocation13] sm:$0xf] %vm121_vm3, %v386_v34  ;;  %v563_v37 = vpop.f32.mrb[3].mxu0 }
 0x387   :  { %791 = shalt.err (!%p788_p12)
}
 0x388   :  { %s792_s0 = scalar_lea.hbm %s1034_s6, 64 }
 0x389   :  { %p793_p13 = scmp.ne.s32.totalorder %s1034_s6, %s792_s0  ;;  %p796_p0 = scmp.lt.u32.totalorder %s792_s0, %s1034_s6 }
 0x38b   :  { %p798_p1 = pnand %p796_p0, %p793_p13 }
 0x38d   :  { %801 = shalt.err (!%p798_p1)
}
 0x38e   :  { %485 = dma.vmem_to_hbm [thread:$0]  %s483_s1, 64, %s1034_s6, [#allocation4]  }
 0x38f   :  { %810 = dma.done.wait [#allocation4], 64  }
 0x390   :  { %811 = vsyncadd [#allocation4], 4294967232 }
 0x391   :  { %812 = dma.done.wait [#allocation15], 128  }
 0x392   :  { %813 = vsyncadd [#allocation15], 4294967168 }
 0x393   :  { %515 = vsyncpa [#allocation3], 1 }
 0x394   :  { %516 = vsyncpa [#allocation6], 1 }
 0x395   :  { %517 = vsyncpa [#allocation9], 1 }
 0x396   :  { %518 = vsyncpa [#allocation12], 1 }
 0x397   :  { %519 = vsyncpa [#allocation4], 1 }
 0x398   :  { %520 = vsyncpa [#allocation15], 1 }

</bundles_post_ra>
